<compile_context>
chip_gen: v7x
topology: tpu7x:2x2x1
jax: 0.10.0
libtpu: 0.0.40
codegen_flags: <defaults>
</compile_context>

<pallas_src>
import functools

import jax
import jax.numpy as jnp
from jax.experimental import pallas as pl
from jax.experimental.pallas import tpu as pltpu


def _round_up(x, m):
    return (x + m - 1) // m * m


def _refined_reciprocal(x):
    """EUP approx reciprocal + one Newton step (≈ f32-exact, off the VPU path)."""
    r = pl.reciprocal(x, approx=True)
    return r * (2.0 - x * r)


def _cluster_assign_kernel(x_ref, ct_ref, cnorm_ref, out_ref, *, alpha):
    # x_ref:     (tile_b, D)      batch tile (f32 or bf16), unpadded D
    # ct_ref:    (D, K_pad)       centers pre-scaled by -2 and transposed (resident)
    # cnorm_ref: (1, K_pad)       ||c||^2 (f32); padded columns hold 1e30 (resident)
    # out_ref:   (tile_b, K_pad)  soft assignments for this tile (f32)
    x = x_ref[...]                                               # (tb, D)

    # ||x||^2 per row, accumulated in f32 even for bf16 inputs.
    xf = x.astype(jnp.float32)
    x_norm = jnp.sum(xf * xf, axis=1, keepdims=True)             # (tb, 1)

    # (-2 x)·c on the MXU, f32 accumulation.  Padded K columns of ct are zero.
    cross = jnp.dot(x, ct_ref[...], preferred_element_type=jnp.float32)  # (tb, K_pad)

    # ||x||^2 + ||c||^2 - 2 x·c ; clamp tiny negatives from cancellation.
    # Padded columns see ||c||^2 = 1e30 -> t huge -> numerator ~ 0 (no mask needed).
    norm_sq = jnp.maximum(x_norm + cnorm_ref[...] + cross, 0.0)

    t = 1.0 + norm_sq * (1.0 / alpha)
    numerator = _refined_reciprocal(t)

    power = float(alpha + 1.0) / 2.0
    if power != 1.0:                      # alpha == 1 (DEC default) -> skip the pow
        numerator = numerator ** power

    denom = jnp.sum(numerator, axis=1, keepdims=True)            # (tb, 1)
    out_ref[...] = (numerator * _refined_reciprocal(denom)).astype(out_ref.dtype)


def _vmem_limits():
    """Generation-aware (limit, tile-budget) in bytes."""
    try:
        cap = int(getattr(pltpu.get_tpu_info(), "vmem_capacity_bytes"))
    except Exception:  # be robust if the query is unavailable
        cap = 64 * 1024 * 1024                      # conservative: v7x per-TC VMEM
    limit = max(32 * 1024 * 1024,
                min(cap - 16 * 1024 * 1024, 100 * 1024 * 1024))
    # ~48 MiB limit / 32 MiB budget on v7x (64 MiB);  ~100 MiB / ~66 MiB on v5e/v6e.
    return limit, (limit * 2) // 3


def _pick_tile_b(B, D, K_pad, itemsize, budget, requested, single_buffer_centers):
    if requested is not None:
        tb = max(8, _round_up(int(requested), 8))
    else:
        tb = min(_round_up(B, 8), 1024)

    nbuf_c = 1 if single_buffer_centers else 2
    fixed = nbuf_c * (D * K_pad * itemsize + K_pad * 4)          # resident centers/cnorm
    while tb > 8:
        stream = 2 * tb * D * itemsize + 2 * tb * K_pad * 4      # dbl-buffered in/out tiles
        temps = (tb * D * 4 if itemsize < 4 else 0) \
            + 3 * tb * K_pad * 4                                 # f32 upcast + cross/t/num
        if fixed + stream + temps <= budget:
            break
        tb = max(8, _round_up(tb // 2, 8))

    # Give the "parallel" grid axis >= 2 tiles so v7x's two TensorCores both get
    # work (an extra ~0.35us step is negligible on single-TC v5e/v6e).
    while tb > 8 and pl.cdiv(B, tb) < 2:
        tb = max(8, _round_up(tb // 2, 8))
    return tb


def cluster_assignment_forward(batch, cluster_centers, alpha=1.0, *,
                               tile_b=None, single_buffer_centers=False):
    """Pallas implementation of ClusterAssignment.forward.

    Args:
      batch:           (B, D) float array of embeddings.
      cluster_centers: (K, D) float array of cluster centers.
      alpha:           Student's-t degrees of freedom (python float).
      tile_b:          optional batch tile size (rounded up to a multiple of 8).
      single_buffer_centers: profile-guided option — single-buffer the
        grid-invariant centers / ||c||^2 residents (saves VMEM on v7x).

    Returns:
      (soft_assignments (B, K) float32, batch) — same tuple as the torch module.
    """
    B, D = batch.shape
    K, D2 = cluster_centers.shape
    assert D == D2, "embedding dims must match"

    # bf16 inputs feed the MXU at full rate; everything else computes in f32.
    # NOTE: with bf16 the ||x||^2+||c||^2-2x·c formulation loses precision for
    # points very close to their center; keep f32 inputs if sharpness matters.
    if batch.dtype == jnp.bfloat16:
        compute_dtype = jnp.bfloat16
        batch_in = batch                              # no copy
    elif batch.dtype == jnp.float32:
        compute_dtype = jnp.float32
        batch_in = batch                              # no copy
    else:
        compute_dtype = jnp.float32
        batch_in = batch.astype(jnp.float32)
    itemsize = jnp.dtype(compute_dtype).itemsize

    K_pad = _round_up(K, 128)
    vmem_limit, budget = _vmem_limits()
    tile_b = _pick_tile_b(B, D, K_pad, itemsize, budget, tile_b,
                          single_buffer_centers)
    grid = (pl.cdiv(B, tile_b),)

    # Grid-invariant center work done once in the wrapper:
    #   centers pre-scaled by -2 (exact) and transposed for the MXU,
    #   ||c||^2 in f32 with padded columns set huge so no in-kernel mask is needed.
    c_f32 = cluster_centers.astype(jnp.float32)
    c_norm = jnp.sum(c_f32 * c_f32, axis=1)                              # (K,)
    c_norm = jnp.pad(c_norm, (0, K_pad - K),
                     constant_values=1e30).reshape(1, K_pad)             # (1, K_pad)
    c_t = jnp.pad((-2.0 * c_f32).astype(compute_dtype),
                  ((0, K_pad - K), (0, 0))).T                            # (D, K_pad)

    center_kwargs = {}
    if single_buffer_centers:
        # Constant index_map => no prefetch needed; halve the resident footprint.
        center_kwargs = dict(pipeline_mode=pl.Buffered(1))

    out = pl.pallas_call(
        functools.partial(_cluster_assign_kernel, alpha=float(alpha)),
        out_shape=jax.ShapeDtypeStruct((B, K_pad), jnp.float32),
        grid_spec=pltpu.PrefetchScalarGridSpec(
            num_scalar_prefetch=0,
            grid=grid,
            in_specs=[
                pl.BlockSpec((tile_b, D), lambda i: (i, 0)),             # batch tile
                pl.BlockSpec((D, K_pad), lambda i: (0, 0),
                             **center_kwargs),                           # -2*centers^T
                pl.BlockSpec((1, K_pad), lambda i: (0, 0),
                             **center_kwargs),                           # ||c||^2
            ],
            out_specs=pl.BlockSpec((tile_b, K_pad), lambda i: (i, 0)),
        ),
        compiler_params=pltpu.CompilerParams(
            dimension_semantics=("parallel",),
            vmem_limit_bytes=vmem_limit,
        ),
    )(batch_in, c_t, c_norm)

    assignments = out if K_pad == K else out[:, :K]
    return assignments, batch


def xavier_uniform_init(key, cluster_number, embedding_dimension):
    # nn.init.xavier_uniform_ on a (K, D) tensor: U(-a, a), a = sqrt(6/(K+D))
    bound = jnp.sqrt(6.0 / (cluster_number + embedding_dimension))
    return jax.random.uniform(
        key, (cluster_number, embedding_dimension),
        minval=-bound, maxval=bound, dtype=jnp.float32)


if __name__ == "__main__":
    key = jax.random.PRNGKey(0)
    k_batch, k_centers = jax.random.split(key)

    # Small shapes consistent with the module: batch of embeddings (B, D),
    # K cluster centers of dim D.
    B, D, K = 8, 32, 4
    alpha = 1.0

    batch = jax.random.normal(k_batch, (B, D), dtype=jnp.float32)
    cluster_centers = xavier_uniform_init(k_centers, K, D)

    assignments, batch_out = cluster_assignment_forward(
        batch, cluster_centers, alpha=alpha)
    jax.block_until_ready(assignments)
    jax.block_until_ready(batch_out)

    # Pure-JAX reference (same math as the torch module).
    norm_sq = jnp.sum((batch[:, None, :] - cluster_centers[None, :, :]) ** 2, axis=2)
    num = 1.0 / (1.0 + norm_sq / alpha)
    num = num ** ((alpha + 1.0) / 2.0)
    ref = num / jnp.sum(num, axis=1, keepdims=True)

    assert assignments.shape == (B, K)
    assert jnp.allclose(assignments, ref, atol=1e-4, rtol=1e-4), (
        float(jnp.max(jnp.abs(assignments - ref))))
    assert jnp.allclose(jnp.sum(assignments, axis=1), 1.0, atol=1e-5)
    assert jnp.allclose(batch_out, batch)

    print("KERNEL_OK")
</pallas_src>

<mosaic_0001>
module attributes {stable_mosaic.version = 11 : i64} {
  func.func @_cluster_assign_kernel(%arg0: i32, %arg1: memref<8x32xf32, #tpu.memory_space<vmem>>, %arg2: memref<32x128xf32, #tpu.memory_space<vmem>>, %arg3: memref<1x128xf32, #tpu.memory_space<vmem>>, %arg4: memref<8x128xf32, #tpu.memory_space<vmem>>) attributes {dimension_semantics = [#tpu.dimension_semantics<parallel>], iteration_bounds = array<i64: 1>, scalar_prefetch = 0 : i64, scratch_operands = 0 : i64, tpu.core_type = #tpu.core_type<tc>, window_params = [{transform_indices = @transform_0, window_bounds = array<i64: 8, 32>}, {pipeline_mode = #tpu.pipeline_mode<synchronous>, transform_indices = @transform_1, window_bounds = array<i64: 32, 128>}, {pipeline_mode = #tpu.pipeline_mode<synchronous>, transform_indices = @transform_2, window_bounds = array<i64: 1, 128>}, {transform_indices = @transform_3, window_bounds = array<i64: 8, 128>}]} {
    %c0 = arith.constant 0 : index
    %c0_0 = arith.constant 0 : index
    %0 = vector.load %arg1[%c0, %c0_0] : memref<8x32xf32, #tpu.memory_space<vmem>>, vector<8x32xf32>
    %1 = arith.mulf %0, %0 : vector<8x32xf32>
    %cst = arith.constant dense<0.000000e+00> : vector<8xf32>
    %2 = vector.multi_reduction <add>, %1, %cst [1] : vector<8x32xf32> to vector<8xf32>
    %3 = vector.shape_cast %2 : vector<8xf32> to vector<8x1xf32>
    %c0_1 = arith.constant 0 : index
    %c0_2 = arith.constant 0 : index
    %4 = vector.load %arg2[%c0_1, %c0_2] : memref<32x128xf32, #tpu.memory_space<vmem>>, vector<32x128xf32>
    %cst_3 = arith.constant dense<0.000000e+00> : vector<8x128xf32>
    %5 = tpu.matmul %0, %4, %cst_3 {dimension_numbers = #tpu.dot_dimension_numbers<[1], [0], [0], [1], [0, 0, 1, 1], [], []>} : vector<8x32xf32>, vector<32x128xf32>, vector<8x128xf32> -> vector<8x128xf32>
    %c0_4 = arith.constant 0 : index
    %c0_5 = arith.constant 0 : index
    %6 = vector.load %arg3[%c0_4, %c0_5] : memref<1x128xf32, #tpu.memory_space<vmem>>, vector<1x128xf32>
    %7 = vector.broadcast %3 : vector<8x1xf32> to vector<8x128xf32>
    %8 = vector.broadcast %6 : vector<1x128xf32> to vector<8x128xf32>
    %9 = arith.addf %7, %8 : vector<8x128xf32>
    %10 = arith.addf %9, %5 : vector<8x128xf32>
    %cst_6 = arith.constant 0.000000e+00 : f32
    %11 = vector.broadcast %cst_6 : f32 to vector<8x128xf32>
    %12 = arith.maximumf %10, %11 : vector<8x128xf32>
    %cst_7 = arith.constant 1.000000e+00 : f32
    %13 = vector.broadcast %cst_7 : f32 to vector<8x128xf32>
    %14 = arith.mulf %12, %13 : vector<8x128xf32>
    %cst_8 = arith.constant 1.000000e+00 : f32
    %15 = vector.broadcast %cst_8 : f32 to vector<8x128xf32>
    %16 = arith.addf %15, %14 : vector<8x128xf32>
    %17 = tpu.reciprocal %16 {approx = true} : vector<8x128xf32> -> vector<8x128xf32>
    %18 = arith.mulf %16, %17 : vector<8x128xf32>
    %cst_9 = arith.constant 2.000000e+00 : f32
    %19 = vector.broadcast %cst_9 : f32 to vector<8x128xf32>
    %20 = arith.subf %19, %18 : vector<8x128xf32>
    %21 = arith.mulf %17, %20 : vector<8x128xf32>
    %cst_10 = arith.constant dense<0.000000e+00> : vector<8xf32>
    %22 = vector.multi_reduction <add>, %21, %cst_10 [1] : vector<8x128xf32> to vector<8xf32>
    %23 = vector.shape_cast %22 : vector<8xf32> to vector<8x1xf32>
    %24 = tpu.reciprocal %23 {approx = true} : vector<8x1xf32> -> vector<8x1xf32>
    %25 = arith.mulf %23, %24 : vector<8x1xf32>
    %cst_11 = arith.constant 2.000000e+00 : f32
    %26 = vector.broadcast %cst_11 : f32 to vector<8x1xf32>
    %27 = arith.subf %26, %25 : vector<8x1xf32>
    %28 = arith.mulf %24, %27 : vector<8x1xf32>
    %29 = vector.broadcast %28 : vector<8x1xf32> to vector<8x128xf32>
    %30 = arith.mulf %21, %29 : vector<8x128xf32>
    %c0_12 = arith.constant 0 : index
    %c0_13 = arith.constant 0 : index
    %31 = vector.load %arg4[%c0_12, %c0_13] : memref<8x128xf32, #tpu.memory_space<vmem>>, vector<8x128xf32>
    tpu.vector_store %arg4[%c0_12, %c0_13], %30 {strides = array<i32>} : memref<8x128xf32, #tpu.memory_space<vmem>>, vector<8x128xf32>,
    return
  }
  func.func @transform_0(%arg0: i32) -> (i32, i32) {
    %c0_i32 = arith.constant 0 : i32
    %c0_i32_0 = arith.constant 0 : i32
    return %arg0, %c0_i32 : i32, i32
  }
  func.func @transform_1(%arg0: i32) -> (i32, i32) {
    %c0_i32 = arith.constant 0 : i32
    %c0_i32_0 = arith.constant 0 : i32
    %c0_i32_1 = arith.constant 0 : i32
    return %c0_i32, %c0_i32_0 : i32, i32
  }
  func.func @transform_2(%arg0: i32) -> (i32, i32) {
    %c0_i32 = arith.constant 0 : i32
    %c0_i32_0 = arith.constant 0 : i32
    %c0_i32_1 = arith.constant 0 : i32
    return %c0_i32, %c0_i32_0 : i32, i32
  }
  func.func @transform_3(%arg0: i32) -> (i32, i32) {
    %c0_i32 = arith.constant 0 : i32
    %c0_i32_0 = arith.constant 0 : i32
    return %arg0, %c0_i32 : i32, i32
  }
}

</mosaic_0001>

<bundles_post_ra>
// kernel: tpu_custom_call.1
= control target key start
LH: loop header
LB: loop body
LE: loop exit
PB: predicated region body
PF: predicated region fallthrough
CT: control target
= control target key end

     0   :  { %8 = vsyncpa [#allocation3], 0  ;;  %s345_s0 = inlined_call_operand.hbm [shape: f32[8,32], index: 0, kind: input, shape index: {}]   ;;  %s346_s1 = inlined_call_operand.hbm [shape: f32[32,128], index: 1, kind: input, shape index: {}]   ;;  %s347_s2 = inlined_call_operand.vmem [shape: f32[1,128], index: 2, kind: input, shape index: {}]   ;;  %s348_s3 = inlined_call_operand.hbm [shape: f32[8,128], index: 3, kind: output, shape index: {}]  }
   0x1   :  { %9 = vsyncpa [#allocation6], 0 }
   0x2   :  { %10 = vsyncpa [#allocation4], 0  ;;  %s271_s12 = smov [#allocation2]   ;;  %s272_s14 = smov [#allocation5]  }
   0x3   :  { %s17_s13 = sshll.u32 %s271_s12, 4  ;;  %s26_s15 = sshll.u32 %s272_s14, 4  ;;  %s18_s13 = int_to_ptr.vmem [resolvable:$true] %s17_s13  ;;  %s299_s15 = int_to_ptr.vmem [resolvable:$true] %s26_s15 }
   0x4   :  { %s199_s18 = scalar_lea.hbm %s345_s0, 128 }
   0x5   :  { %p200_p0 = scmp.ne.s32.totalorder %s345_s0, %s199_s18  ;;  %p203_p1 = scmp.lt.u32.totalorder %s199_s18, %s345_s0 }
   0x7   :  { %p205_p2 = pnand %p203_p1, %p200_p0 }
   0x9   :  { %208 = shalt.err (!%p205_p2)
}
   0xa   :  { %s209_s23 = scalar_lea.vmem %s18_s13, 128  ;;  %p214_p4 = scmp.lt.s32.totalorder %s18_s13, %s18_s13 }
   0xb   :  { %p210_p3 = scmp.ne.s32.totalorder %s18_s13, %s209_s23  ;;  %p215_p5 = scmp.lt.s32.totalorder %s209_s23, %s209_s23 }
   0xd   :  { %p216_p6 = por %p215_p5, %p214_p4 }
   0xf   :  { %p217_p7 = pnand %p216_p6, %p210_p3 }
  0x11   :  { %220 = shalt.err (!%p217_p7)
}
  0x12   :  { %20 = dma.hbm_to_vmem [thread:$0]  %s345_s0, 128, %s18_s13, [#allocation3]  }
  0x13   :  { %s221_s28 = scalar_lea.hbm %s346_s1, 512 }
  0x14   :  { %p222_p8 = scmp.ne.s32.totalorder %s346_s1, %s221_s28  ;;  %p225_p9 = scmp.lt.u32.totalorder %s221_s28, %s346_s1 }
  0x16   :  { %p227_p10 = pnand %p225_p9, %p222_p8 }
  0x18   :  { %230 = shalt.err (!%p227_p10)
}
  0x19   :  { %s231_s6 = scalar_lea.vmem %s299_s15, 512  ;;  %p236_p12 = scmp.lt.s32.totalorder %s299_s15, %s299_s15 }
  0x1a   :  { %p232_p11 = scmp.ne.s32.totalorder %s299_s15, %s231_s6  ;;  %p237_p13 = scmp.lt.s32.totalorder %s231_s6, %s231_s6 }
  0x1c   :  { %p238_p0 = por %p237_p13, %p236_p12 }
  0x1e   :  { %p239_p1 = pnand %p238_p0, %p232_p11 }
  0x20   :  { %242 = shalt.err (!%p239_p1)
}
  0x21   :  { %s273_s0 = smov 128   ;;  %s274_s7 = smov 8  }
  0x22   :  { %32 = dma.hbm_to_vmem [thread:$0]  %s346_s1, 512, %s299_s15, [#allocation6], %s273_s0, %s273_s0, %s274_s7  }
  0x23   :  { %265 = dma.done.wait [#allocation3], 128  }
  0x24   :  { %266 = vsyncadd [#allocation3], 4294967168 }
  0x25   :  { %267 = dma.done.wait [#allocation6], 512  }
  0x26   :  { %268 = vsyncadd [#allocation6], 4294966784  ;;  %v275_v0 = vmov 0.0|0.0   ;;  %vm276_vm0 = vmmov 0   ;;  %v277_v1 = vmov 0.0   ;;  %v47_v2 = vld [vmem:[#allocation5] sm:$0xff] }
  0x27   :  { %181 = vmatprep.subr.bf16.mxu0 %v275_v0  ;;  %178 = vmatprep.mubr.msk.f32.mxu0 %vm276_vm0, %v277_v1  ;;  %v48_v3 = vld [vmem:[#allocation5 + $0x8] sm:$0xff]  ;;  %v49_v4 = vld [vmem:[#allocation5 + $0x10] sm:$0xff]  ;;  %v50_v6 = vld [vmem:[#allocation5 + $0x18] sm:$0xff]  ;;  %vm43_vm1 = vcmask 261120   ;;  %s278_s11 = smov [#allocation7]  }
  0x28   :  { %v182_v5 = vpack.c.bf16 %v48_v3, %v47_v2  ;;  %v41_v7 = vld [vmem:[#allocation2] sm:$0xff]  ;;  %v185_v9 = vpack.c.bf16 %v50_v6, %v49_v4 }
  0x29   :  { %v42_v8 = vmul.f32 %v41_v7, %v41_v7  ;;  %v164_v11 = vld [vmem:[%s347_s2] ss:$0 sm:$0xff]  ;;  %s153_s2 = sshll.u32 %s278_s11, 4  ;;  %s154_s2 = int_to_ptr.vmem [resolvable:$true] %s153_s2 }
  0x2a   :  { %183 = vmatpush3.bf16.msra.mxu0 %v182_v5  ;;  %s243_s12 = scalar_lea.vmem %s154_s2, 128  ;;  %p248_p3 = scmp.lt.s32.totalorder %s154_s2, %s154_s2 }
  0x2b   :  { %184 = vmatprep.subr.bf16.mxu0 %v275_v0  ;;  %v44_v10 = vsel %vm43_vm1, %v42_v8, 0.0  ;;  %p244_p2 = scmp.ne.s32.totalorder %s154_s2, %s243_s12  ;;  %p249_p4 = scmp.lt.s32.totalorder %s243_s12, %s243_s12 }
  0x2c   :  { %45 = vadd.xlane.f32.xlu0 %v44_v10 }
  0x2d   :  { %p250_p5 = por %p249_p4, %p248_p3 }
  0x2e   :  { %186 = vmatpush3.bf16.msra.mxu0 %v185_v9 }
  0x2f   :  { %p251_p6 = pnand %p250_p5, %p244_p2 }
  0x31   :  { %179 = vmatmul.mubr.msk.f32.vlgmr.msra.gmra.mrb[0].mxu0 %vm43_vm1, %v41_v7 }
  0xb9   :  { %v46_v12 = vpop.xlane.xlu0 %45 }
  0xba   :  { %v131_v13 = vadd.f32 %v164_v11, %v46_v12 }
 0x104   :  { %v120_v14 = vpop.f32.mrb[0].mxu0 }
 0x105   :  { %v132_v15 = vadd.f32 %v131_v13, %v120_v14  ;;  %v180_v16 = vpop.f32.mrb[1].mxu0 }
 0x107   :  { %v133_v17 = vmax.f32 %v132_v15, 0.0 }
 0x109   :  { %v134_v18 = vadd.f32 1.0, %v133_v17 }
 0x10b   :  { %195 = vrcp.f32 %v134_v18 }
 0x115   :  { %v196_v19 = vpop.eup %195 }
 0x116   :  { %v136_v20 = vmul.f32 %v196_v19, %v134_v18 }
 0x118   :  { %v137_v21 = vsub.f32 2.0, %v136_v20 }
 0x11a   :  { %v138_v22 = vmul.f32 %v196_v19, %v137_v21 }
 0x11c   :  { %139 = vadd.xlane.f32.xlu0 %v138_v22 }
 0x1a9   :  { %v140_v23 = vpop.xlane.xlu0 %139 }
 0x1aa   :  { %197 = vrcp.f32 %v140_v23 }
 0x1b4   :  { %v198_v24 = vpop.eup %197 }
 0x1b5   :  { %v142_v25 = vmul.f32 %v198_v24, %v140_v23 }
 0x1b7   :  { %v143_v26 = vsub.f32 2.0, %v142_v25 }
 0x1b9   :  { %v144_v27 = vmul.f32 %v198_v24, %v143_v26 }
 0x1bb   :  { %v145_v28 = vmul.f32 %v144_v27, %v138_v22 }
 0x1bd   :  { %146 = vst [vmem:[#allocation7] sm:$0xff] %v145_v28 }
 0x1be   :  { %254 = shalt.err (!%p251_p6)
}
 0x1bf   :  { %s255_s15 = scalar_lea.hbm %s348_s3, 128 }
 0x1c0   :  { %p256_p7 = scmp.ne.s32.totalorder %s348_s3, %s255_s15  ;;  %p259_p8 = scmp.lt.u32.totalorder %s255_s15, %s348_s3 }
 0x1c2   :  { %p261_p9 = pnand %p259_p8, %p256_p7 }
 0x1c4   :  { %264 = shalt.err (!%p261_p9)
}
 0x1c5   :  { %156 = dma.vmem_to_hbm [thread:$0]  %s154_s2, 128, %s348_s3, [#allocation4]  }
 0x1c6   :  { %269 = dma.done.wait [#allocation4], 128  }
 0x1c7   :  { %270 = vsyncadd [#allocation4], 4294967168 }
 0x1c8   :  { %160 = vsyncpa [#allocation3], 1 }
 0x1c9   :  { %161 = vsyncpa [#allocation6], 1 }
 0x1ca   :  { %162 = vsyncpa [#allocation4], 1 }

</bundles_post_ra>
